<compile_context>
chip_gen: v6e
topology: v6e:2x2x1
jax: 0.10.0
libtpu: 0.0.40
codegen_flags: <defaults>
</compile_context>

<pallas_src>
import math

import jax
import jax.numpy as jnp
from jax.experimental import pallas as pl
from jax.experimental.pallas import tpu as pltpu


def _round_up(x, m):
    return (x + m - 1) // m * m


def _pad2(a, rows, cols):
    return jnp.pad(a, ((0, rows - a.shape[0]), (0, cols - a.shape[1])))


def _pick_tile_n(n_nodes):
    """Largest row tile such that a double-buffered bf16 adj row stripe stays
    under ~32 MiB and (when possible) there are >= 2 row tiles for megacore."""
    budget = 32 * 1024 * 1024
    tile_n = 1024
    while tile_n > 128:
        n_pad = _round_up(n_nodes, tile_n)
        stripe_bytes = 2 * tile_n * n_pad * 2  # double-buffered bf16 stripe
        if stripe_bytes <= budget and n_pad // tile_n >= 2:
            return tile_n
        tile_n //= 2
    return 128


# --------------------- support = x @ W (computed ONCE per layer) -------------

def _support_kernel(x_ref, w_ref, out_ref):
    out_ref[...] = jnp.dot(
        x_ref[...], w_ref[...], preferred_element_type=jnp.float32
    ).astype(out_ref.dtype)


def _support_matmul(x, w, *, tile_n):
    """(n_pad, f_in_pad) @ (f_in_pad, f_out_pad) -> (n_pad, f_out_pad) bf16."""
    n_pad, f_in_pad = x.shape
    f_out_pad = w.shape[1]
    return pl.pallas_call(
        _support_kernel,
        out_shape=jax.ShapeDtypeStruct((n_pad, f_out_pad), jnp.bfloat16),
        grid_spec=pltpu.PrefetchScalarGridSpec(
            num_scalar_prefetch=0,
            grid=(n_pad // tile_n,),
            in_specs=[
                pl.BlockSpec((tile_n, f_in_pad), lambda i: (i, 0)),     # x stripe
                pl.BlockSpec((f_in_pad, f_out_pad), lambda i: (0, 0)),  # W resident
            ],
            out_specs=pl.BlockSpec((tile_n, f_out_pad), lambda i: (i, 0)),
        ),
        compiler_params=pltpu.CompilerParams(
            dimension_semantics=("parallel",),
            vmem_limit_bytes=48 * 1024 * 1024,
        ),
    )(x, w)


# ------------- out = act(adj_row_stripe @ support + b)  (adj-streaming) ------

def _make_aggregate_kernel(activation, n_valid_cols):
    def kernel(adj_ref, s_ref, b_ref, out_ref):
        # Single MXU dot per row stripe; f32 accumulation + f32 epilogue.
        y = jnp.dot(adj_ref[...], s_ref[...],
                    preferred_element_type=jnp.float32) + b_ref[...]
        if activation == "relu":
            y = jnp.maximum(y, 0.0)
        elif activation == "log_softmax":
            # Mask lane-padded class columns so they don't perturb softmax.
            col = jax.lax.broadcasted_iota(jnp.int32, y.shape, 1)
            y = jnp.where(col < n_valid_cols, y, -1e30)
            m = jnp.max(y, axis=1, keepdims=True)
            z = y - m
            lse = jnp.log(jnp.sum(jnp.exp(z), axis=1, keepdims=True))
            y = z - lse
        out_ref[...] = y.astype(out_ref.dtype)

    return kernel


def _aggregate(adj, support, b, *, activation, n_valid_cols, tile_n, out_dtype):
    n_pad = adj.shape[0]
    f_out_pad = support.shape[1]
    kernel = _make_aggregate_kernel(activation, n_valid_cols)
    return pl.pallas_call(
        kernel,
        out_shape=jax.ShapeDtypeStruct((n_pad, f_out_pad), out_dtype),
        grid_spec=pltpu.PrefetchScalarGridSpec(
            num_scalar_prefetch=0,
            grid=(n_pad // tile_n,),
            in_specs=[
                pl.BlockSpec((tile_n, n_pad), lambda i: (i, 0)),      # adj row stripe
                pl.BlockSpec((n_pad, f_out_pad), lambda i: (0, 0)),   # support, VMEM-resident
                pl.BlockSpec((1, f_out_pad), lambda i: (0, 0)),       # bias
            ],
            out_specs=pl.BlockSpec((tile_n, f_out_pad), lambda i: (i, 0)),
        ),
        compiler_params=pltpu.CompilerParams(
            dimension_semantics=("parallel",),
            vmem_limit_bytes=48 * 1024 * 1024,
        ),
    )(adj, support, b)


@jax.jit
def gcn_forward(x, adj, w1, b1, w2, b2):
    """GCN forward: per layer, one small support matmul + one adj-streaming
    aggregation kernel (row-stripe, no k axis, no accumulator scratch)."""
    n_nodes, f_in = x.shape
    f_out = w1.shape[1]
    n_class = w2.shape[1]

    tile_n = _pick_tile_n(n_nodes)
    n_pad = _round_up(n_nodes, tile_n)          # rows pad only to tile_n
    f_in_pad = _round_up(f_in, 128)
    f_out_pad = _round_up(f_out, 128)
    c_pad = _round_up(n_class, 128)

    # Pad to lane-aligned shapes; cast MXU operands to bf16 (halves adj DMA).
    adj_p = _pad2(adj, n_pad, n_pad).astype(jnp.bfloat16)
    x_p = _pad2(x, n_pad, f_in_pad).astype(jnp.bfloat16)
    w1_p = _pad2(w1, f_in_pad, f_out_pad).astype(jnp.bfloat16)
    b1_p = _pad2(b1.reshape(1, -1), 1, f_out_pad).astype(jnp.float32)
    w2_p = _pad2(w2, f_out_pad, c_pad).astype(jnp.bfloat16)
    b2_p = _pad2(b2.reshape(1, -1), 1, c_pad).astype(jnp.float32)

    # Layer 1: h = relu(adj @ (x @ W1) + b1)
    s1 = _support_matmul(x_p, w1_p, tile_n=tile_n)                 # once, bf16
    h = _aggregate(adj_p, s1, b1_p, activation="relu",
                   n_valid_cols=f_out, tile_n=tile_n,
                   out_dtype=jnp.bfloat16)

    # Head: log_softmax(adj @ (h @ W2) + b2, axis=1)
    s2 = _support_matmul(h, w2_p, tile_n=tile_n)                   # once, bf16
    logits = _aggregate(adj_p, s2, b2_p, activation="log_softmax",
                        n_valid_cols=n_class, tile_n=tile_n,
                        out_dtype=jnp.float32)

    return logits[:n_nodes, :n_class]


def init_gcn_params(key, in_channels, out_channels, n_class):
    """Deterministic init mirroring GCNConv.reset_parameters (uniform(-stdv, stdv))."""
    k1, k2, k3, k4 = jax.random.split(key, 4)
    stdv1 = 1.0 / math.sqrt(out_channels)
    stdv2 = 1.0 / math.sqrt(n_class)
    w1 = jax.random.uniform(k1, (in_channels, out_channels), jnp.float32,
                            minval=-stdv1, maxval=stdv1)
    b1 = jax.random.uniform(k2, (1, out_channels), jnp.float32,
                            minval=-stdv1, maxval=stdv1)
    w2 = jax.random.uniform(k3, (out_channels, n_class), jnp.float32,
                            minval=-stdv2, maxval=stdv2)
    b2 = jax.random.uniform(k4, (1, n_class), jnp.float32,
                            minval=-stdv2, maxval=stdv2)
    return w1, b1, w2, b2


def make_normalized_adj(key, n_nodes, p_edge=0.3):
    """Dense symmetric adjacency with self-loops, symmetric normalization."""
    a = (jax.random.uniform(key, (n_nodes, n_nodes)) < p_edge).astype(jnp.float32)
    a = jnp.maximum(a, a.T)
    a = a + jnp.eye(n_nodes, dtype=jnp.float32)
    deg = jnp.sum(a, axis=1)
    d_inv_sqrt = 1.0 / jnp.sqrt(deg)
    return a * d_inv_sqrt[:, None] * d_inv_sqrt[None, :]


def _reference(x, adj, w1, b1, w2, b2):
    h = jnp.maximum(adj @ (x @ w1) + b1, 0.0)
    logits = adj @ (h @ w2) + b2
    return jax.nn.log_softmax(logits, axis=1)


if __name__ == "__main__":
    key = jax.random.PRNGKey(0)
    k_x, k_adj, k_par = jax.random.split(key, 3)

    n_nodes = 16
    in_channels = 8
    out_channels = 32
    n_class = 4

    x = jax.random.normal(k_x, (n_nodes, in_channels), jnp.float32)
    adj = make_normalized_adj(k_adj, n_nodes)
    w1, b1, w2, b2 = init_gcn_params(k_par, in_channels, out_channels, n_class)

    out = jax.block_until_ready(gcn_forward(x, adj, w1, b1, w2, b2))
    expected = _reference(x, adj, w1, b1, w2, b2)

    assert out.shape == (n_nodes, n_class)
    # log_softmax rows exponentiate-sum to ~1
    row_sums = jnp.exp(out).sum(axis=1)
    assert bool(jnp.all(jnp.abs(row_sums - 1.0) < 1e-4))
    # matches f32 reference within bf16-matmul tolerance
    assert bool(jnp.max(jnp.abs(out - expected)) < 0.1)

    print("KERNEL_OK")
</pallas_src>

<mosaic_0001>
module attributes {stable_mosaic.version = 11 : i64} {
  func.func @_support_kernel(%arg0: i32, %arg1: memref<128x128xbf16, #tpu.memory_space<vmem>>, %arg2: memref<128x128xbf16, #tpu.memory_space<vmem>>, %arg3: memref<128x128xbf16, #tpu.memory_space<vmem>>) attributes {dimension_semantics = [#tpu.dimension_semantics<parallel>], iteration_bounds = array<i64: 1>, scalar_prefetch = 0 : i64, scratch_operands = 0 : i64, tpu.core_type = #tpu.core_type<tc>, window_params = [{transform_indices = @transform_0, window_bounds = array<i64: 128, 128>}, {pipeline_mode = #tpu.pipeline_mode<synchronous>, transform_indices = @transform_1, window_bounds = array<i64: 128, 128>}, {transform_indices = @transform_2, window_bounds = array<i64: 128, 128>}]} {
    %c0 = arith.constant 0 : index
    %c0_0 = arith.constant 0 : index
    %0 = vector.load %arg1[%c0, %c0_0] : memref<128x128xbf16, #tpu.memory_space<vmem>>, vector<128x128xbf16>
    %c0_1 = arith.constant 0 : index
    %c0_2 = arith.constant 0 : index
    %1 = vector.load %arg2[%c0_1, %c0_2] : memref<128x128xbf16, #tpu.memory_space<vmem>>, vector<128x128xbf16>
    %cst = arith.constant dense<0.000000e+00> : vector<128x128xf32>
    %2 = tpu.matmul %0, %1, %cst {dimension_numbers = #tpu.dot_dimension_numbers<[1], [0], [0], [1], [0, 0, 1, 1], [], []>} : vector<128x128xbf16>, vector<128x128xbf16>, vector<128x128xf32> -> vector<128x128xf32>
    %3 = arith.truncf %2 : vector<128x128xf32> to vector<128x128xbf16>
    %c0_3 = arith.constant 0 : index
    %c0_4 = arith.constant 0 : index
    %4 = vector.load %arg3[%c0_3, %c0_4] : memref<128x128xbf16, #tpu.memory_space<vmem>>, vector<128x128xbf16>
    tpu.vector_store %arg3[%c0_3, %c0_4], %3 {strides = array<i32>} : memref<128x128xbf16, #tpu.memory_space<vmem>>, vector<128x128xbf16>,
    return
  }
  func.func @transform_0(%arg0: i32) -> (i32, i32) {
    %c0_i32 = arith.constant 0 : i32
    %c0_i32_0 = arith.constant 0 : i32
    return %arg0, %c0_i32 : i32, i32
  }
  func.func @transform_1(%arg0: i32) -> (i32, i32) {
    %c0_i32 = arith.constant 0 : i32
    %c0_i32_0 = arith.constant 0 : i32
    %c0_i32_1 = arith.constant 0 : i32
    return %c0_i32, %c0_i32_0 : i32, i32
  }
  func.func @transform_2(%arg0: i32) -> (i32, i32) {
    %c0_i32 = arith.constant 0 : i32
    %c0_i32_0 = arith.constant 0 : i32
    return %arg0, %c0_i32 : i32, i32
  }
}

module attributes {stable_mosaic.version = 11 : i64} {
  func.func @kernel(%arg0: i32, %arg1: memref<128x128xbf16, #tpu.memory_space<vmem>>, %arg2: memref<128x128xbf16, #tpu.memory_space<vmem>>, %arg3: memref<1x128xf32, #tpu.memory_space<vmem>>, %arg4: memref<128x128xbf16, #tpu.memory_space<vmem>>) attributes {dimension_semantics = [#tpu.dimension_semantics<parallel>], iteration_bounds = array<i64: 1>, scalar_prefetch = 0 : i64, scratch_operands = 0 : i64, tpu.core_type = #tpu.core_type<tc>, window_params = [{transform_indices = @transform_0, window_bounds = array<i64: 128, 128>}, {pipeline_mode = #tpu.pipeline_mode<synchronous>, transform_indices = @transform_1, window_bounds = array<i64: 128, 128>}, {pipeline_mode = #tpu.pipeline_mode<synchronous>, transform_indices = @transform_2, window_bounds = array<i64: 1, 128>}, {transform_indices = @transform_3, window_bounds = array<i64: 128, 128>}]} {
    %c0 = arith.constant 0 : index
    %c0_0 = arith.constant 0 : index
    %0 = vector.load %arg1[%c0, %c0_0] : memref<128x128xbf16, #tpu.memory_space<vmem>>, vector<128x128xbf16>
    %c0_1 = arith.constant 0 : index
    %c0_2 = arith.constant 0 : index
    %1 = vector.load %arg2[%c0_1, %c0_2] : memref<128x128xbf16, #tpu.memory_space<vmem>>, vector<128x128xbf16>
    %cst = arith.constant dense<0.000000e+00> : vector<128x128xf32>
    %2 = tpu.matmul %0, %1, %cst {dimension_numbers = #tpu.dot_dimension_numbers<[1], [0], [0], [1], [0, 0, 1, 1], [], []>} : vector<128x128xbf16>, vector<128x128xbf16>, vector<128x128xf32> -> vector<128x128xf32>
    %c0_3 = arith.constant 0 : index
    %c0_4 = arith.constant 0 : index
    %3 = vector.load %arg3[%c0_3, %c0_4] : memref<1x128xf32, #tpu.memory_space<vmem>>, vector<1x128xf32>
    %4 = vector.broadcast %3 : vector<1x128xf32> to vector<128x128xf32>
    %5 = arith.addf %2, %4 : vector<128x128xf32>
    %cst_5 = arith.constant 0.000000e+00 : f32
    %6 = vector.broadcast %cst_5 : f32 to vector<128x128xf32>
    %7 = arith.maximumf %5, %6 : vector<128x128xf32>
    %8 = arith.truncf %7 : vector<128x128xf32> to vector<128x128xbf16>
    %c0_6 = arith.constant 0 : index
    %c0_7 = arith.constant 0 : index
    %9 = vector.load %arg4[%c0_6, %c0_7] : memref<128x128xbf16, #tpu.memory_space<vmem>>, vector<128x128xbf16>
    tpu.vector_store %arg4[%c0_6, %c0_7], %8 {strides = array<i32>} : memref<128x128xbf16, #tpu.memory_space<vmem>>, vector<128x128xbf16>,
    return
  }
  func.func @transform_0(%arg0: i32) -> (i32, i32) {
    %c0_i32 = arith.constant 0 : i32
    %c0_i32_0 = arith.constant 0 : i32
    return %arg0, %c0_i32 : i32, i32
  }
  func.func @transform_1(%arg0: i32) -> (i32, i32) {
    %c0_i32 = arith.constant 0 : i32
    %c0_i32_0 = arith.constant 0 : i32
    %c0_i32_1 = arith.constant 0 : i32
    return %c0_i32, %c0_i32_0 : i32, i32
  }
  func.func @transform_2(%arg0: i32) -> (i32, i32) {
    %c0_i32 = arith.constant 0 : i32
    %c0_i32_0 = arith.constant 0 : i32
    %c0_i32_1 = arith.constant 0 : i32
    return %c0_i32, %c0_i32_0 : i32, i32
  }
  func.func @transform_3(%arg0: i32) -> (i32, i32) {
    %c0_i32 = arith.constant 0 : i32
    %c0_i32_0 = arith.constant 0 : i32
    return %arg0, %c0_i32 : i32, i32
  }
}

module attributes {stable_mosaic.version = 11 : i64} {
  func.func @kernel(%arg0: i32, %arg1: memref<128x128xbf16, #tpu.memory_space<vmem>>, %arg2: memref<128x128xbf16, #tpu.memory_space<vmem>>, %arg3: memref<1x128xf32, #tpu.memory_space<vmem>>, %arg4: memref<128x128xf32, #tpu.memory_space<vmem>>) attributes {dimension_semantics = [#tpu.dimension_semantics<parallel>], iteration_bounds = array<i64: 1>, scalar_prefetch = 0 : i64, scratch_operands = 0 : i64, tpu.core_type = #tpu.core_type<tc>, window_params = [{transform_indices = @transform_0, window_bounds = array<i64: 128, 128>}, {pipeline_mode = #tpu.pipeline_mode<synchronous>, transform_indices = @transform_1, window_bounds = array<i64: 128, 128>}, {pipeline_mode = #tpu.pipeline_mode<synchronous>, transform_indices = @transform_2, window_bounds = array<i64: 1, 128>}, {transform_indices = @transform_3, window_bounds = array<i64: 128, 128>}]} {
    %c0 = arith.constant 0 : index
    %c0_0 = arith.constant 0 : index
    %0 = vector.load %arg1[%c0, %c0_0] : memref<128x128xbf16, #tpu.memory_space<vmem>>, vector<128x128xbf16>
    %c0_1 = arith.constant 0 : index
    %c0_2 = arith.constant 0 : index
    %1 = vector.load %arg2[%c0_1, %c0_2] : memref<128x128xbf16, #tpu.memory_space<vmem>>, vector<128x128xbf16>
    %cst = arith.constant dense<0.000000e+00> : vector<128x128xf32>
    %2 = tpu.matmul %0, %1, %cst {dimension_numbers = #tpu.dot_dimension_numbers<[1], [0], [0], [1], [0, 0, 1, 1], [], []>} : vector<128x128xbf16>, vector<128x128xbf16>, vector<128x128xf32> -> vector<128x128xf32>
    %c0_3 = arith.constant 0 : index
    %c0_4 = arith.constant 0 : index
    %3 = vector.load %arg3[%c0_3, %c0_4] : memref<1x128xf32, #tpu.memory_space<vmem>>, vector<1x128xf32>
    %4 = vector.broadcast %3 : vector<1x128xf32> to vector<128x128xf32>
    %5 = arith.addf %2, %4 : vector<128x128xf32>
    %6 = tpu.iota {dimensions = array<i32: 1>} : vector<128x128xi32>
    %c4_i32 = arith.constant 4 : i32
    %7 = vector.broadcast %c4_i32 : i32 to vector<128x128xi32>
    %8 = arith.cmpi slt, %6, %7 : vector<128x128xi32>
    %cst_5 = arith.constant -1.000000e+30 : f32
    %9 = vector.broadcast %cst_5 : f32 to vector<128x128xf32>
    %10 = arith.select %8, %5, %9 : vector<128x128xi1>, vector<128x128xf32>
    %cst_6 = arith.constant dense<0xFF800000> : vector<128xf32>
    %11 = vector.multi_reduction <maximumf>, %10, %cst_6 [1] : vector<128x128xf32> to vector<128xf32>
    %12 = vector.shape_cast %11 : vector<128xf32> to vector<128x1xf32>
    %13 = vector.broadcast %12 : vector<128x1xf32> to vector<128x128xf32>
    %14 = arith.subf %10, %13 : vector<128x128xf32>
    %15 = math.exp %14 : vector<128x128xf32>
    %cst_7 = arith.constant dense<0.000000e+00> : vector<128xf32>
    %16 = vector.multi_reduction <add>, %15, %cst_7 [1] : vector<128x128xf32> to vector<128xf32>
    %17 = vector.shape_cast %16 : vector<128xf32> to vector<128x1xf32>
    %18 = math.log %17 : vector<128x1xf32>
    %19 = vector.broadcast %18 : vector<128x1xf32> to vector<128x128xf32>
    %20 = arith.subf %14, %19 : vector<128x128xf32>
    %c0_8 = arith.constant 0 : index
    %c0_9 = arith.constant 0 : index
    %21 = vector.load %arg4[%c0_8, %c0_9] : memref<128x128xf32, #tpu.memory_space<vmem>>, vector<128x128xf32>
    tpu.vector_store %arg4[%c0_8, %c0_9], %20 {strides = array<i32>} : memref<128x128xf32, #tpu.memory_space<vmem>>, vector<128x128xf32>,
    return
  }
  func.func @transform_0(%arg0: i32) -> (i32, i32) {
    %c0_i32 = arith.constant 0 : i32
    %c0_i32_0 = arith.constant 0 : i32
    return %arg0, %c0_i32 : i32, i32
  }
  func.func @transform_1(%arg0: i32) -> (i32, i32) {
    %c0_i32 = arith.constant 0 : i32
    %c0_i32_0 = arith.constant 0 : i32
    %c0_i32_1 = arith.constant 0 : i32
    return %c0_i32, %c0_i32_0 : i32, i32
  }
  func.func @transform_2(%arg0: i32) -> (i32, i32) {
    %c0_i32 = arith.constant 0 : i32
    %c0_i32_0 = arith.constant 0 : i32
    %c0_i32_1 = arith.constant 0 : i32
    return %c0_i32, %c0_i32_0 : i32, i32
  }
  func.func @transform_3(%arg0: i32) -> (i32, i32) {
    %c0_i32 = arith.constant 0 : i32
    %c0_i32_0 = arith.constant 0 : i32
    return %arg0, %c0_i32 : i32, i32
  }
}

</mosaic_0001>

<bundles_post_ra>
// kernel: gcn_forward.5
= control target key start
LH: loop header
LB: loop body
LE: loop exit
PB: predicated region body
PF: predicated region fallthrough
CT: control target
= control target key end

     0   :  { %s618_s1 = inlined_call_operand.vmem [shape: bf16[128,128], index: 1, kind: input, shape index: {}]   ;;  %s619_s0 = inlined_call_operand.vmem [shape: bf16[128,128], index: 0, kind: input, shape index: {}]   ;;  %s620_s2 = inlined_call_operand.vmem [shape: f32[1,128], index: 2, kind: input, shape index: {}]   ;;  %s621_s3 = inlined_call_operand.vmem [shape: bf16[128,128], index: 3, kind: output, shape index: {}]  }
   0x1   :  { %v507_v0 = vld [vmem:[%s618_s1 + $0x38] sm:$0xff]   ;;  %v508_v1 = vld [vmem:[%s618_s1 + $0x30] sm:$0xff]   ;;  %v509_v2 = vld [vmem:[%s618_s1 + $0x28] sm:$0xff]  }
   0x2   :  { %459 = vmatprep.subr.bf16.mxu0 %v507_v0  ;;  %491 = vmatprep.subr.bf16.mxu1 %v507_v0  ;;  %v510_v3 = vld [vmem:[%s618_s1 + $0x20] sm:$0xff]   ;;  %v511_v6 = vld [vmem:[%s618_s1 + $0x18] sm:$0xff]   ;;  %v512_v7 = vld [vmem:[%s618_s1 + $0x10] sm:$0xff]  }
   0x3   :  { %460 = vmatpush3.bf16.msra.mxu0 %v507_v0  ;;  %499 = vmatpush3.bf16.msra.mxu1 %v507_v0  ;;  %v515_v4 = vld [vmem:[%s619_s0] sm:$0xff]   ;;  %v513_v8 = vld [vmem:[%s618_s1 + $0x8] sm:$0xff]   ;;  %v519_v12 = vld [vmem:[%s619_s0 + $0x10] sm:$0xff]  }
   0x4   :  { %461 = vmatprep.subr.bf16.mxu0 %v508_v1  ;;  %492 = vmatprep.subr.bf16.mxu1 %v508_v1  ;;  %v516_v5 = vld [vmem:[%s619_s0 + $0x20] sm:$0xff]   ;;  %v517_v10 = vld [vmem:[%s619_s0 + $0x8] sm:$0xff]   ;;  %v520_v13 = vld [vmem:[%s619_s0 + $0x30] sm:$0xff]  }
   0x5   :  { %475 = vmatprep.mubr.bf16.mxu0 %v515_v4  ;;  %483 = vmatprep.mubr.bf16.mxu1 %v516_v5  ;;  %v514_v9 = vld [vmem:[%s618_s1] sm:$0xff]   ;;  %v518_v11 = vld [vmem:[%s619_s0 + $0x28] sm:$0xff]   ;;  %v521_v14 = vld [vmem:[%s619_s0 + $0x18] sm:$0xff]  }
   0x6   :  { %v522_v15 = vld [vmem:[%s619_s0 + $0x38] sm:$0xff]   ;;  %v347_v16 = vld [vmem:[%s620_s2] ss:$0 sm:$0xff] }
   0x7   :  { %462 = vmatpush3.bf16.msra.mxu0 %v508_v1  ;;  %500 = vmatpush3.bf16.msra.mxu1 %v508_v1 }
   0x8   :  { %463 = vmatprep.subr.bf16.mxu0 %v509_v2  ;;  %493 = vmatprep.subr.bf16.mxu1 %v509_v2 }
   0xb   :  { %464 = vmatpush3.bf16.msra.mxu0 %v509_v2  ;;  %501 = vmatpush3.bf16.msra.mxu1 %v509_v2 }
   0xc   :  { %465 = vmatprep.subr.bf16.mxu0 %v510_v3  ;;  %494 = vmatprep.subr.bf16.mxu1 %v510_v3 }
   0xf   :  { %466 = vmatpush3.bf16.msra.mxu0 %v510_v3  ;;  %502 = vmatpush3.bf16.msra.mxu1 %v510_v3 }
  0x10   :  { %467 = vmatprep.subr.bf16.mxu0 %v511_v6  ;;  %495 = vmatprep.subr.bf16.mxu1 %v511_v6 }
  0x13   :  { %468 = vmatpush3.bf16.msra.mxu0 %v511_v6  ;;  %503 = vmatpush3.bf16.msra.mxu1 %v511_v6 }
  0x14   :  { %469 = vmatprep.subr.bf16.mxu0 %v512_v7  ;;  %496 = vmatprep.subr.bf16.mxu1 %v512_v7 }
  0x17   :  { %470 = vmatpush3.bf16.msra.mxu0 %v512_v7  ;;  %504 = vmatpush3.bf16.msra.mxu1 %v512_v7 }
  0x18   :  { %471 = vmatprep.subr.bf16.mxu0 %v513_v8  ;;  %497 = vmatprep.subr.bf16.mxu1 %v513_v8 }
  0x1b   :  { %472 = vmatpush3.bf16.msra.mxu0 %v513_v8  ;;  %505 = vmatpush3.bf16.msra.mxu1 %v513_v8 }
  0x1c   :  { %473 = vmatprep.subr.bf16.mxu0 %v514_v9  ;;  %498 = vmatprep.subr.bf16.mxu1 %v514_v9 }
  0x1f   :  { %474 = vmatpush3.bf16.msra.mxu0 %v514_v9  ;;  %506 = vmatpush3.bf16.msra.mxu1 %v514_v9 }
  0x22   :  { %476 = vmatmul.mubr.bf16.vlgmr.msra.gmra.mxu0 %v517_v10  ;;  %484 = vmatmul.mubr.bf16.vlgmr.msra.gmra.mxu1 %v518_v11 }
  0x23   :  { %479 = vmatprep.mubr.bf16.mxu0 %v519_v12  ;;  %487 = vmatprep.mubr.bf16.mxu1 %v520_v13 }
  0x2a   :  { %480 = vmatmul.mubr.bf16.gmra.mxu0 %v521_v14  ;;  %488 = vmatmul.mubr.bf16.gmra.mxu1 %v522_v15 }
  0xe2   :  { %v477_v17 = vpop.f32.mrf.mxu0  ;;  %v485_v18 = vpop.f32.mrf.mxu1 }
  0xe3   :  { %v193_v19 = vadd.f32 %v477_v17, %v347_v16  ;;  %v225_v20 = vadd.f32 %v485_v18, %v347_v16 }
  0xe4   :  { %v184_v21 = vpop.f32.mrf.mxu0  ;;  %v216_v22 = vpop.f32.mrf.mxu1 }
  0xe5   :  { %v185_v23 = vadd.f32 %v347_v16, %v184_v21  ;;  %v217_v24 = vadd.f32 %v347_v16, %v216_v22  ;;  %v249_v29 = vmax.f32 %v193_v19, 0.0  ;;  %v257_v30 = vmax.f32 %v225_v20, 0.0 }
  0xe6   :  { %v478_v25 = vpop.f32.mrf.mxu0  ;;  %v486_v26 = vpop.f32.mrf.mxu1 }
  0xe7   :  { %v196_v27 = vadd.f32 %v478_v25, %v347_v16  ;;  %v228_v28 = vadd.f32 %v486_v26, %v347_v16  ;;  %v247_v37 = vmax.f32 %v185_v23, 0.0  ;;  %v255_v38 = vmax.f32 %v217_v24, 0.0 }
  0xe8   :  { %v187_v31 = vpop.f32.mrf.mxu0  ;;  %v219_v32 = vpop.f32.mrf.mxu1 }
  0xe9   :  { %v250_v33 = vmax.f32 %v196_v27, 0.0  ;;  %v258_v34 = vmax.f32 %v228_v28, 0.0  ;;  %v188_v35 = vadd.f32 %v347_v16, %v187_v31  ;;  %v220_v36 = vadd.f32 %v347_v16, %v219_v32 }
  0xea   :  { %v481_v39 = vpop.f32.mrf.mxu0  ;;  %v489_v40 = vpop.f32.mrf.mxu1 }
  0xeb   :  { %v404_v41 = vpack.c.bf16 %v250_v33, %v249_v29  ;;  %v424_v42 = vpack.c.bf16 %v258_v34, %v257_v30  ;;  %v248_v43 = vmax.f32 %v188_v35, 0.0  ;;  %v256_v44 = vmax.f32 %v220_v36, 0.0 }
  0xec   :  { %v209_v45 = vadd.f32 %v481_v39, %v347_v16  ;;  %v241_v46 = vadd.f32 %v489_v40, %v347_v16  ;;  %v200_v47 = vpop.f32.mrf.mxu0  ;;  %v232_v48 = vpop.f32.mrf.mxu1 }
  0xed   :  { %436 = vst [vmem:[%s621_s3 + $0x8] sm:$0xff] %v404_v41   ;;  %440 = vst [vmem:[%s621_s3 + $0x28] sm:$0xff] %v424_v42   ;;  %v399_v49 = vpack.c.bf16 %v248_v43, %v247_v37  ;;  %v419_v50 = vpack.c.bf16 %v256_v44, %v255_v38  ;;  %v201_v51 = vadd.f32 %v347_v16, %v200_v47 }
  0xee   :  { %v233_v52 = vadd.f32 %v347_v16, %v232_v48  ;;  %v482_v53 = vpop.f32.mrf.mxu0  ;;  %v490_v54 = vpop.f32.mrf.mxu1  ;;  %v253_v57 = vmax.f32 %v209_v45, 0.0  ;;  %v261_v58 = vmax.f32 %v241_v46, 0.0 }
  0xef   :  { %400 = vst [vmem:[%s621_s3] sm:$0xff] %v399_v49   ;;  %439 = vst [vmem:[%s621_s3 + $0x20] sm:$0xff] %v419_v50   ;;  %v212_v55 = vadd.f32 %v482_v53, %v347_v16  ;;  %v244_v56 = vadd.f32 %v490_v54, %v347_v16  ;;  %v251_v1 = vmax.f32 %v201_v51, 0.0 }
  0xf0   :  { %v203_v59 = vpop.f32.mrf.mxu0  ;;  %v235_v60 = vpop.f32.mrf.mxu1  ;;  %v259_v2 = vmax.f32 %v233_v52, 0.0 }
  0xf1   :  { %v254_v61 = vmax.f32 %v212_v55, 0.0  ;;  %v262_v62 = vmax.f32 %v244_v56, 0.0  ;;  %v204_v63 = vadd.f32 %v347_v16, %v203_v59  ;;  %v236_v0 = vadd.f32 %v347_v16, %v235_v60 }
  0xf3   :  { %v414_v3 = vpack.c.bf16 %v254_v61, %v253_v57  ;;  %v434_v4 = vpack.c.bf16 %v262_v62, %v261_v58  ;;  %v252_v5 = vmax.f32 %v204_v63, 0.0  ;;  %v260_v6 = vmax.f32 %v236_v0, 0.0 }
  0xf5   :  { %438 = vst [vmem:[%s621_s3 + $0x18] sm:$0xff] %v414_v3   ;;  %442 = vst [vmem:[%s621_s3 + $0x38] sm:$0xff] %v434_v4   ;;  %v409_v7 = vpack.c.bf16 %v252_v5, %v251_v1  ;;  %v429_v8 = vpack.c.bf16 %v260_v6, %v259_v2 }
  0xf7   :  { %437 = vst [vmem:[%s621_s3 + $0x10] sm:$0xff] %v409_v7   ;;  %441 = vst [vmem:[%s621_s3 + $0x30] sm:$0xff] %v429_v8  }

// kernel: gcn_forward.4
= control target key start
LH: loop header
LB: loop body
LE: loop exit
PB: predicated region body
PF: predicated region fallthrough
CT: control target
= control target key end

     0   :  { %s583_s1 = inlined_call_operand.vmem [shape: bf16[128,128], index: 1, kind: input, shape index: {}]   ;;  %s584_s0 = inlined_call_operand.vmem [shape: bf16[128,128], index: 0, kind: input, shape index: {}]   ;;  %s585_s2 = inlined_call_operand.vmem [shape: bf16[128,128], index: 2, kind: output, shape index: {}]  }
   0x1   :  { %v480_v0 = vld [vmem:[%s583_s1 + $0x38] sm:$0xff]   ;;  %v481_v1 = vld [vmem:[%s583_s1 + $0x30] sm:$0xff]   ;;  %v482_v2 = vld [vmem:[%s583_s1 + $0x28] sm:$0xff]  }
   0x2   :  { %432 = vmatprep.subr.bf16.mxu0 %v480_v0  ;;  %464 = vmatprep.subr.bf16.mxu1 %v480_v0  ;;  %v483_v3 = vld [vmem:[%s583_s1 + $0x20] sm:$0xff]   ;;  %v484_v6 = vld [vmem:[%s583_s1 + $0x18] sm:$0xff]   ;;  %v485_v7 = vld [vmem:[%s583_s1 + $0x10] sm:$0xff]  }
   0x3   :  { %433 = vmatpush3.bf16.msra.mxu0 %v480_v0  ;;  %472 = vmatpush3.bf16.msra.mxu1 %v480_v0  ;;  %v488_v4 = vld [vmem:[%s584_s0] sm:$0xff]   ;;  %v486_v8 = vld [vmem:[%s583_s1 + $0x8] sm:$0xff]   ;;  %v492_v12 = vld [vmem:[%s584_s0 + $0x10] sm:$0xff]  }
   0x4   :  { %434 = vmatprep.subr.bf16.mxu0 %v481_v1  ;;  %465 = vmatprep.subr.bf16.mxu1 %v481_v1  ;;  %v489_v5 = vld [vmem:[%s584_s0 + $0x20] sm:$0xff]   ;;  %v490_v10 = vld [vmem:[%s584_s0 + $0x8] sm:$0xff]   ;;  %v493_v13 = vld [vmem:[%s584_s0 + $0x30] sm:$0xff]  }
   0x5   :  { %448 = vmatprep.mubr.bf16.mxu0 %v488_v4  ;;  %456 = vmatprep.mubr.bf16.mxu1 %v489_v5  ;;  %v487_v9 = vld [vmem:[%s583_s1] sm:$0xff]   ;;  %v491_v11 = vld [vmem:[%s584_s0 + $0x28] sm:$0xff]   ;;  %v494_v14 = vld [vmem:[%s584_s0 + $0x18] sm:$0xff]  }
   0x6   :  { %v495_v15 = vld [vmem:[%s584_s0 + $0x38] sm:$0xff]  }
   0x7   :  { %435 = vmatpush3.bf16.msra.mxu0 %v481_v1  ;;  %473 = vmatpush3.bf16.msra.mxu1 %v481_v1 }
   0x8   :  { %436 = vmatprep.subr.bf16.mxu0 %v482_v2  ;;  %466 = vmatprep.subr.bf16.mxu1 %v482_v2 }
   0xb   :  { %437 = vmatpush3.bf16.msra.mxu0 %v482_v2  ;;  %474 = vmatpush3.bf16.msra.mxu1 %v482_v2 }
   0xc   :  { %438 = vmatprep.subr.bf16.mxu0 %v483_v3  ;;  %467 = vmatprep.subr.bf16.mxu1 %v483_v3 }
   0xf   :  { %439 = vmatpush3.bf16.msra.mxu0 %v483_v3  ;;  %475 = vmatpush3.bf16.msra.mxu1 %v483_v3 }
  0x10   :  { %440 = vmatprep.subr.bf16.mxu0 %v484_v6  ;;  %468 = vmatprep.subr.bf16.mxu1 %v484_v6 }
  0x13   :  { %441 = vmatpush3.bf16.msra.mxu0 %v484_v6  ;;  %476 = vmatpush3.bf16.msra.mxu1 %v484_v6 }
  0x14   :  { %442 = vmatprep.subr.bf16.mxu0 %v485_v7  ;;  %469 = vmatprep.subr.bf16.mxu1 %v485_v7 }
  0x17   :  { %443 = vmatpush3.bf16.msra.mxu0 %v485_v7  ;;  %477 = vmatpush3.bf16.msra.mxu1 %v485_v7 }
  0x18   :  { %444 = vmatprep.subr.bf16.mxu0 %v486_v8  ;;  %470 = vmatprep.subr.bf16.mxu1 %v486_v8 }
  0x1b   :  { %445 = vmatpush3.bf16.msra.mxu0 %v486_v8  ;;  %478 = vmatpush3.bf16.msra.mxu1 %v486_v8 }
  0x1c   :  { %446 = vmatprep.subr.bf16.mxu0 %v487_v9  ;;  %471 = vmatprep.subr.bf16.mxu1 %v487_v9 }
  0x1f   :  { %447 = vmatpush3.bf16.msra.mxu0 %v487_v9  ;;  %479 = vmatpush3.bf16.msra.mxu1 %v487_v9 }
  0x22   :  { %449 = vmatmul.mubr.bf16.vlgmr.msra.gmra.mxu0 %v490_v10  ;;  %457 = vmatmul.mubr.bf16.vlgmr.msra.gmra.mxu1 %v491_v11 }
  0x23   :  { %452 = vmatprep.mubr.bf16.mxu0 %v492_v12  ;;  %460 = vmatprep.mubr.bf16.mxu1 %v493_v13 }
  0x2a   :  { %453 = vmatmul.mubr.bf16.gmra.mxu0 %v494_v14  ;;  %461 = vmatmul.mubr.bf16.gmra.mxu1 %v495_v15 }
  0xe2   :  { %v450_v16 = vpop.f32.mrf.mxu0  ;;  %v458_v17 = vpop.f32.mrf.mxu1 }
  0xe4   :  { %v174_v18 = vpop.f32.mrf.mxu0  ;;  %v206_v19 = vpop.f32.mrf.mxu1 }
  0xe6   :  { %v451_v20 = vpop.f32.mrf.mxu0  ;;  %v459_v21 = vpop.f32.mrf.mxu1 }
  0xe7   :  { %v377_v22 = vpack.c.bf16 %v451_v20, %v450_v16  ;;  %v397_v23 = vpack.c.bf16 %v459_v21, %v458_v17 }
  0xe8   :  { %v177_v24 = vpop.f32.mrf.mxu0  ;;  %v209_v25 = vpop.f32.mrf.mxu1 }
  0xe9   :  { %409 = vst [vmem:[%s585_s2 + $0x8] sm:$0xff] %v377_v22   ;;  %413 = vst [vmem:[%s585_s2 + $0x28] sm:$0xff] %v397_v23   ;;  %v372_v26 = vpack.c.bf16 %v177_v24, %v174_v18  ;;  %v392_v27 = vpack.c.bf16 %v209_v25, %v206_v19 }
  0xea   :  { %v454_v28 = vpop.f32.mrf.mxu0  ;;  %v462_v29 = vpop.f32.mrf.mxu1 }
  0xeb   :  { %373 = vst [vmem:[%s585_s2] sm:$0xff] %v372_v26   ;;  %412 = vst [vmem:[%s585_s2 + $0x20] sm:$0xff] %v392_v27  }
  0xec   :  { %v190_v30 = vpop.f32.mrf.mxu0  ;;  %v222_v31 = vpop.f32.mrf.mxu1 }
  0xee   :  { %v455_v32 = vpop.f32.mrf.mxu0  ;;  %v463_v33 = vpop.f32.mrf.mxu1 }
  0xef   :  { %v387_v34 = vpack.c.bf16 %v455_v32, %v454_v28  ;;  %v407_v35 = vpack.c.bf16 %v463_v33, %v462_v29 }
  0xf0   :  { %v193_v36 = vpop.f32.mrf.mxu0  ;;  %v225_v37 = vpop.f32.mrf.mxu1 }
  0xf1   :  { %411 = vst [vmem:[%s585_s2 + $0x18] sm:$0xff] %v387_v34   ;;  %415 = vst [vmem:[%s585_s2 + $0x38] sm:$0xff] %v407_v35   ;;  %v382_v38 = vpack.c.bf16 %v193_v36, %v190_v30  ;;  %v402_v39 = vpack.c.bf16 %v225_v37, %v222_v31 }
  0xf3   :  { %410 = vst [vmem:[%s585_s2 + $0x10] sm:$0xff] %v382_v38   ;;  %414 = vst [vmem:[%s585_s2 + $0x30] sm:$0xff] %v402_v39  }

// kernel: gcn_forward.7
= control target key start
LH: loop header
LB: loop body
LE: loop exit
PB: predicated region body
PF: predicated region fallthrough
CT: control target
= control target key end

     0   :  { %v247_v16 = vlaneseq  ;;  %s833_s1 = inlined_call_operand.vmem [shape: bf16[128,128], index: 1, kind: input, shape index: {}]   ;;  %s834_s0 = inlined_call_operand.vmem [shape: bf16[128,128], index: 0, kind: input, shape index: {}]   ;;  %s835_s2 = inlined_call_operand.vmem [shape: f32[1,128], index: 2, kind: input, shape index: {}]   ;;  %s836_s3 = inlined_call_operand.vmem [shape: f32[128,128], index: 3, kind: output, shape index: {}]  }
   0x1   :  { %v527_v0 = vld [vmem:[%s833_s1 + $0x38] sm:$0xff]   ;;  %v528_v1 = vld [vmem:[%s833_s1 + $0x30] sm:$0xff]   ;;  %v529_v2 = vld [vmem:[%s833_s1 + $0x28] sm:$0xff]  }
   0x2   :  { %479 = vmatprep.subr.bf16.mxu0 %v527_v0  ;;  %511 = vmatprep.subr.bf16.mxu1 %v527_v0  ;;  %v530_v3 = vld [vmem:[%s833_s1 + $0x20] sm:$0xff]   ;;  %v531_v6 = vld [vmem:[%s833_s1 + $0x18] sm:$0xff]   ;;  %v532_v7 = vld [vmem:[%s833_s1 + $0x10] sm:$0xff]   ;;  %v675_v17 = vand.u32 127, %v247_v16 }
   0x3   :  { %480 = vmatpush3.bf16.msra.mxu0 %v527_v0  ;;  %519 = vmatpush3.bf16.msra.mxu1 %v527_v0  ;;  %v535_v4 = vld [vmem:[%s834_s0] sm:$0xff]   ;;  %v533_v8 = vld [vmem:[%s833_s1 + $0x8] sm:$0xff]   ;;  %v539_v12 = vld [vmem:[%s834_s0 + $0x10] sm:$0xff]  }
   0x4   :  { %481 = vmatprep.subr.bf16.mxu0 %v528_v1  ;;  %512 = vmatprep.subr.bf16.mxu1 %v528_v1  ;;  %v536_v5 = vld [vmem:[%s834_s0 + $0x20] sm:$0xff]   ;;  %v537_v10 = vld [vmem:[%s834_s0 + $0x8] sm:$0xff]   ;;  %v541_v13 = vld [vmem:[%s834_s0 + $0x30] sm:$0xff]   ;;  %vm249_vm0 = vcmp.lt.s32.totalorder %v675_v17, 4 }
   0x5   :  { %495 = vmatprep.mubr.bf16.mxu0 %v535_v4  ;;  %503 = vmatprep.mubr.bf16.mxu1 %v536_v5  ;;  %v534_v9 = vld [vmem:[%s833_s1] sm:$0xff]   ;;  %v538_v11 = vld [vmem:[%s834_s0 + $0x28] sm:$0xff]   ;;  %v540_v14 = vld [vmem:[%s834_s0 + $0x18] sm:$0xff]  }
   0x6   :  { %v542_v15 = vld [vmem:[%s834_s0 + $0x38] sm:$0xff]   ;;  %v446_v18 = vld [vmem:[%s835_s2] ss:$0 sm:$0xff] }
   0x7   :  { %482 = vmatpush3.bf16.msra.mxu0 %v528_v1  ;;  %520 = vmatpush3.bf16.msra.mxu1 %v528_v1 }
   0x8   :  { %483 = vmatprep.subr.bf16.mxu0 %v529_v2  ;;  %513 = vmatprep.subr.bf16.mxu1 %v529_v2 }
   0xb   :  { %484 = vmatpush3.bf16.msra.mxu0 %v529_v2  ;;  %521 = vmatpush3.bf16.msra.mxu1 %v529_v2 }
   0xc   :  { %485 = vmatprep.subr.bf16.mxu0 %v530_v3  ;;  %514 = vmatprep.subr.bf16.mxu1 %v530_v3 }
   0xf   :  { %486 = vmatpush3.bf16.msra.mxu0 %v530_v3  ;;  %522 = vmatpush3.bf16.msra.mxu1 %v530_v3 }
  0x10   :  { %487 = vmatprep.subr.bf16.mxu0 %v531_v6  ;;  %515 = vmatprep.subr.bf16.mxu1 %v531_v6 }
  0x13   :  { %488 = vmatpush3.bf16.msra.mxu0 %v531_v6  ;;  %523 = vmatpush3.bf16.msra.mxu1 %v531_v6 }
  0x14   :  { %489 = vmatprep.subr.bf16.mxu0 %v532_v7  ;;  %516 = vmatprep.subr.bf16.mxu1 %v532_v7 }
  0x17   :  { %490 = vmatpush3.bf16.msra.mxu0 %v532_v7  ;;  %524 = vmatpush3.bf16.msra.mxu1 %v532_v7 }
  0x18   :  { %491 = vmatprep.subr.bf16.mxu0 %v533_v8  ;;  %517 = vmatprep.subr.bf16.mxu1 %v533_v8 }
  0x1b   :  { %492 = vmatpush3.bf16.msra.mxu0 %v533_v8  ;;  %525 = vmatpush3.bf16.msra.mxu1 %v533_v8 }
  0x1c   :  { %493 = vmatprep.subr.bf16.mxu0 %v534_v9  ;;  %518 = vmatprep.subr.bf16.mxu1 %v534_v9 }
  0x1f   :  { %494 = vmatpush3.bf16.msra.mxu0 %v534_v9  ;;  %526 = vmatpush3.bf16.msra.mxu1 %v534_v9 }
  0x22   :  { %496 = vmatmul.mubr.bf16.vlgmr.msra.gmra.mxu0 %v537_v10  ;;  %504 = vmatmul.mubr.bf16.vlgmr.msra.gmra.mxu1 %v538_v11 }
  0x23   :  { %499 = vmatprep.mubr.bf16.mxu0 %v539_v12  ;;  %507 = vmatprep.mubr.bf16.mxu1 %v541_v13 }
  0x2a   :  { %500 = vmatmul.mubr.bf16.gmra.mxu0 %v540_v14  ;;  %508 = vmatmul.mubr.bf16.gmra.mxu1 %v542_v15 }
  0xe2   :  { %v497_v19 = vpop.f32.mrf.mxu0  ;;  %v505_v20 = vpop.f32.mrf.mxu1 }
  0xe3   :  { %v193_v21 = vadd.f32 %v497_v19, %v446_v18  ;;  %v225_v22 = vadd.f32 %v505_v20, %v446_v18 }
  0xe4   :  { %v184_v23 = vpop.f32.mrf.mxu0  ;;  %v216_v24 = vpop.f32.mrf.mxu1 }
  0xe5   :  { %v185_v25 = vadd.f32 %v446_v18, %v184_v23  ;;  %v260_v26 = vsel %vm249_vm0, %v225_v22, -1e+30  ;;  %v252_v27 = vsel %vm249_vm0, %v193_v21, -1e+30  ;;  %v217_v33 = vadd.f32 %v446_v18, %v216_v24 }
  0xe6   :  { %286 = vmax.xlane.f32.xlu0 %v260_v26  ;;  %v506_v28 = vpop.f32.mrf.mxu1  ;;  %270 = vmax.xlane.f32.xlu1 %v252_v27  ;;  %v498_v29 = vpop.f32.mrf.mxu0 }
  0xe7   :  { %v196_v30 = vadd.f32 %v498_v29, %v446_v18  ;;  %v228_v34 = vadd.f32 %v506_v28, %v446_v18  ;;  %v250_v36 = vsel %vm249_vm0, %v185_v25, -1e+30  ;;  %v258_v43 = vsel %vm249_vm0, %v217_v33, -1e+30 }
  0xe8   :  { %v187_v31 = vpop.f32.mrf.mxu0  ;;  %v219_v32 = vpop.f32.mrf.mxu1 }
  0xe9   :  { %v253_v35 = vsel %vm249_vm0, %v196_v30, -1e+30  ;;  %v188_v40 = vadd.f32 %v446_v18, %v187_v31  ;;  %v220_v41 = vadd.f32 %v446_v18, %v219_v32  ;;  %v261_v42 = vsel %vm249_vm0, %v228_v34, -1e+30 }
  0xea   :  { %272 = vmax.xlane.f32.xlu1 %v253_v35  ;;  %266 = vmax.xlane.f32.xlu0 %v250_v36  ;;  %v501_v37 = vpop.f32.mrf.mxu0  ;;  %v509_v38 = vpop.f32.mrf.mxu1 }
  0xeb   :  { %v209_v46 = vadd.f32 %v501_v37, %v446_v18  ;;  %v259_v48 = vsel %vm249_vm0, %v220_v41, -1e+30  ;;  %v251_v49 = vsel %vm249_vm0, %v188_v40, -1e+30  ;;  %v241_v61 = vadd.f32 %v509_v38, %v446_v18 }
  0xec   :  { %v200_v39 = vpop.f32.mrf.mxu0  ;;  %v232_v45 = vpop.f32.mrf.mxu1 }
  0xed   :  { %v256_v53 = vsel %vm249_vm0, %v209_v46, -1e+30  ;;  %v201_v54 = vadd.f32 %v446_v18, %v200_v39  ;;  %v233_v57 = vadd.f32 %v446_v18, %v232_v45  ;;  %v715_v2 = vsel %vm249_vm0, %v241_v61, -1e+30 }
  0xee   :  { %288 = vmax.xlane.f32.xlu1 %v261_v42  ;;  %282 = vmax.xlane.f32.xlu0 %v258_v43  ;;  %v502_v44 = vpop.f32.mrf.mxu0  ;;  %v510_v51 = vpop.f32.mrf.mxu1 }
  0xef   :  { %v212_v47 = vadd.f32 %v502_v44, %v446_v18  ;;  %v254_v60 = vsel %vm249_vm0, %v201_v54, -1e+30  ;;  %v244_v62 = vadd.f32 %v510_v51, %v446_v18  ;;  %v262_v0 = vsel %vm249_vm0, %v233_v57, -1e+30 }
  0xf0   :  { %v203_v50 = vpop.f32.mrf.mxu0  ;;  %v235_v56 = vpop.f32.mrf.mxu1 }
  0xf1   :  { %v257_v52 = vsel %vm249_vm0, %v212_v47, -1e+30  ;;  %v204_v55 = vadd.f32 %v446_v18, %v203_v50  ;;  %v236_v58 = vadd.f32 %v446_v18, %v235_v56  ;;  %v711_v1 = vsel %vm249_vm0, %v244_v62, -1e+30 }
  0xf2   :  { %284 = vmax.xlane.f32.xlu1 %v259_v48  ;;  %268 = vmax.xlane.f32.xlu0 %v251_v49 }
  0xf3   :  { %v255_v59 = vsel %vm249_vm0, %v204_v55, -1e+30  ;;  %v263_v63 = vsel %vm249_vm0, %v236_v58, -1e+30 }
  0xf6   :  { %280 = vmax.xlane.f32.xlu1 %v257_v52  ;;  %278 = vmax.xlane.f32.xlu0 %v256_v53 }
  0xfa   :  { %276 = vmax.xlane.f32.xlu1 %v255_v59  ;;  %274 = vmax.xlane.f32.xlu0 %v254_v60 }
  0xfe   :  { %292 = vmax.xlane.f32.xlu1 %v263_v63  ;;  %290 = vmax.xlane.f32.xlu0 %v262_v0 }
 0x102   :  { %296 = vmax.xlane.f32.xlu1 %v711_v1  ;;  %294 = vmax.xlane.f32.xlu0 %v715_v2 }
 0x16f   :  { %v287_v3 = vpop.xlane.xlu0 %286  ;;  %v271_v4 = vpop.xlane.xlu1 %270 }
 0x170   :  { %v719_v5 = vsub.f32 %v252_v27, %v271_v4  ;;  %v721_v6 = vsub.f32 %v260_v26, %v287_v3 }
 0x172   :  { %v318_v7 = vmul.f32 1.442695, %v719_v5  ;;  %v334_v11 = vmul.f32 1.442695, %v721_v6 }
 0x173   :  { %v273_v8 = vpop.xlane.xlu1 %272  ;;  %v267_v9 = vpop.xlane.xlu0 %266 }
 0x174   :  { %v724_v10 = vsub.f32 %v253_v35, %v273_v8  ;;  %543 = vpow2.f32 %v318_v7  ;;  %v727_v12 = vsub.f32 %v250_v36, %v267_v9 }
 0x176   :  { %v320_v13 = vmul.f32 1.442695, %v724_v10  ;;  %v314_v18 = vmul.f32 1.442695, %v727_v12 }
 0x177   :  { %v289_v14 = vpop.xlane.xlu1 %288  ;;  %v283_v15 = vpop.xlane.xlu0 %282 }
 0x178   :  { %545 = vpow2.f32 %v320_v13  ;;  %v730_v16 = vsub.f32 %v261_v42, %v289_v14  ;;  %v732_v17 = vsub.f32 %v258_v43, %v283_v15 }
 0x179   :  { %547 = vpow2.f32 %v334_v11 }
 0x17a   :  { %v336_v19 = vmul.f32 1.442695, %v730_v16  ;;  %v330_v22 = vmul.f32 1.442695, %v732_v17 }
 0x17b   :  { %v285_v20 = vpop.xlane.xlu1 %284  ;;  %v269_v21 = vpop.xlane.xlu0 %268 }
 0x17c   :  { %549 = vpow2.f32 %v336_v19  ;;  %v737_v23 = vsub.f32 %v259_v48, %v285_v20  ;;  %v739_v24 = vsub.f32 %v251_v49, %v269_v21 }
 0x17d   :  { %551 = vpow2.f32 %v314_v18 }
 0x17e   :  { %v316_v25 = vmul.f32 1.442695, %v739_v24  ;;  %553 = vpow2.f32 %v330_v22  ;;  %v332_v28 = vmul.f32 1.442695, %v737_v23 }
 0x17f   :  { %v281_v26 = vpop.xlane.xlu1 %280  ;;  %v279_v27 = vpop.xlane.xlu0 %278 }
 0x180   :  { %v743_v29 = vsub.f32 %v257_v52, %v281_v26  ;;  %v745_v30 = vsub.f32 %v256_v53, %v279_v27  ;;  %555 = vpow2.f32 %v316_v25 }
 0x181   :  { %v544_v31 = vpop.eup %543  ;;  %557 = vpow2.f32 %v332_v28 }
 0x182   :  { %v326_v32 = vmul.f32 1.442695, %v745_v30  ;;  %350 = vadd.xlane.f32.xlu0 %v544_v31  ;;  %v328_v35 = vmul.f32 1.442695, %v743_v29 }
 0x183   :  { %v277_v33 = vpop.xlane.xlu1 %276  ;;  %v275_v34 = vpop.xlane.xlu0 %274 }
 0x184   :  { %v749_v36 = vsub.f32 %v255_v59, %v277_v33  ;;  %v751_v37 = vsub.f32 %v254_v60, %v275_v34  ;;  %559 = vpow2.f32 %v326_v32 }
 0x185   :  { %v546_v38 = vpop.eup %545  ;;  %561 = vpow2.f32 %v328_v35 }
 0x186   :  { %v548_v39 = vpop.eup %547  ;;  %v322_v40 = vmul.f32 1.442695, %v751_v37  ;;  %352 = vadd.xlane.f32.xlu1 %v546_v38  ;;  %v324_v43 = vmul.f32 1.442695, %v749_v36 }
 0x187   :  { %366 = vadd.xlane.f32.xlu0 %v548_v39  ;;  %v293_v41 = vpop.xlane.xlu1 %292  ;;  %v291_v42 = vpop.xlane.xlu0 %290 }
 0x188   :  { %v755_v44 = vsub.f32 %v263_v63, %v293_v41  ;;  %v757_v45 = vsub.f32 %v262_v0, %v291_v42  ;;  %563 = vpow2.f32 %v322_v40 }
 0x189   :  { %v550_v46 = vpop.eup %549  ;;  %565 = vpow2.f32 %v324_v43 }
 0x18a   :  { %v552_v47 = vpop.eup %551  ;;  %v338_v48 = vmul.f32 1.442695, %v757_v45  ;;  %368 = vadd.xlane.f32.xlu1 %v550_v46  ;;  %v340_v51 = vmul.f32 1.442695, %v755_v44 }
 0x18b   :  { %346 = vadd.xlane.f32.xlu0 %v552_v47  ;;  %v297_v49 = vpop.xlane.xlu1 %296  ;;  %v295_v50 = vpop.xlane.xlu0 %294 }
 0x18c   :  { %v762_v52 = vsub.f32 %v715_v2, %v295_v50  ;;  %v554_v53 = vpop.eup %553  ;;  %567 = vpow2.f32 %v338_v48  ;;  %v765_v54 = vsub.f32 %v711_v1, %v297_v49 }
 0x18d   :  { %v556_v55 = vpop.eup %555  ;;  %569 = vpow2.f32 %v340_v51 }
 0x18e   :  { %v342_v56 = vmul.f32 1.442695, %v762_v52  ;;  %348 = vadd.xlane.f32.xlu1 %v556_v55  ;;  %v558_v57 = vpop.eup %557  ;;  %v344_v58 = vmul.f32 1.442695, %v765_v54 }
 0x18f   :  { %362 = vadd.xlane.f32.xlu0 %v554_v53 }
 0x190   :  { %571 = vpow2.f32 %v342_v56 }
 0x191   :  { %v560_v59 = vpop.eup %559  ;;  %573 = vpow2.f32 %v344_v58 }
 0x192   :  { %364 = vadd.xlane.f32.xlu1 %v558_v57  ;;  %v562_v60 = vpop.eup %561 }
 0x193   :  { %358 = vadd.xlane.f32.xlu0 %v560_v59 }
 0x195   :  { %v564_v61 = vpop.eup %563 }
 0x196   :  { %360 = vadd.xlane.f32.xlu1 %v562_v60  ;;  %v566_v62 = vpop.eup %565 }
 0x197   :  { %354 = vadd.xlane.f32.xlu0 %v564_v61 }
 0x199   :  { %v568_v63 = vpop.eup %567 }
 0x19a   :  { %356 = vadd.xlane.f32.xlu1 %v566_v62  ;;  %v570_v0 = vpop.eup %569 }
 0x19b   :  { %370 = vadd.xlane.f32.xlu0 %v568_v63 }
 0x19d   :  { %v572_v1 = vpop.eup %571 }
 0x19e   :  { %372 = vadd.xlane.f32.xlu1 %v570_v0  ;;  %v574_v2 = vpop.eup %573 }
 0x19f   :  { %374 = vadd.xlane.f32.xlu0 %v572_v1 }
 0x1a2   :  { %376 = vadd.xlane.f32.xlu1 %v574_v2 }
 0x20b   :  { %v351_v3 = vpop.xlane.xlu0 %350 }
 0x20c   :  { %575 = vlog2.f32 %v351_v3 }
 0x20f   :  { %v353_v4 = vpop.xlane.xlu1 %352 }
 0x210   :  { %577 = vlog2.f32 %v353_v4  ;;  %v367_v7 = vpop.xlane.xlu0 %366 }
 0x211   :  { %579 = vlog2.f32 %v367_v7 }
 0x213   :  { %v369_v8 = vpop.xlane.xlu1 %368 }
 0x214   :  { %581 = vlog2.f32 %v369_v8  ;;  %v347_v9 = vpop.xlane.xlu0 %346 }
 0x215   :  { %583 = vlog2.f32 %v347_v9 }
 0x217   :  { %v349_v11 = vpop.xlane.xlu1 %348 }
 0x218   :  { %v363_v13 = vpop.xlane.xlu0 %362  ;;  %585 = vlog2.f32 %v349_v11 }
 0x219   :  { %v576_v14 = vpop.eup %575  ;;  %587 = vlog2.f32 %v363_v13 }
 0x21a   :  { %v383_v15 = vmul.f32 0.6931472, %v576_v14 }
 0x21b   :  { %v365_v18 = vpop.xlane.xlu1 %364 }
 0x21c   :  { %v359_v19 = vpop.xlane.xlu0 %358  ;;  %v412_v21 = vsub.f32 %v719_v5, %v383_v15  ;;  %589 = vlog2.f32 %v365_v18 }
 0x21d   :  { %v578_v20 = vpop.eup %577  ;;  %591 = vlog2.f32 %v359_v19 }
 0x21e   :  { %v580_v22 = vpop.eup %579  ;;  %v385_v25 = vmul.f32 0.6931472, %v578_v20  ;;  %428 = vst [vmem:[%s836_s3 + $0x10] sm:$0xff] %v412_v21 }
 0x21f   :  { %v399_v26 = vmul.f32 0.6931472, %v580_v22  ;;  %v361_v28 = vpop.xlane.xlu1 %360 }
 0x220   :  { %v413_v27 = vsub.f32 %v724_v10, %v385_v25  ;;  %v355_v31 = vpop.xlane.xlu0 %354  ;;  %593 = vlog2.f32 %v361_v28 }
 0x221   :  { %v582_v32 = vpop.eup %581  ;;  %v420_v33 = vsub.f32 %v721_v6, %v399_v26  ;;  %595 = vlog2.f32 %v355_v31 }
 0x222   :  { %v584_v34 = vpop.eup %583  ;;  %429 = vst [vmem:[%s836_s3 + $0x18] sm:$0xff] %v413_v27  ;;  %v401_v5 = vmul.f32 0.6931472, %v582_v32 }
 0x223   :  { %436 = vst [vmem:[%s836_s3 + $0x50] sm:$0xff] %v420_v33  ;;  %v379_v35 = vmul.f32 0.6931472, %v584_v34  ;;  %v357_v38 = vpop.xlane.xlu1 %356 }
 0x224   :  { %v421_v10 = vsub.f32 %v730_v16, %v401_v5  ;;  %v371_v39 = vpop.xlane.xlu0 %370  ;;  %597 = vlog2.f32 %v357_v38 }
 0x225   :  { %v410_v40 = vsub.f32 %v727_v12, %v379_v35  ;;  %v586_v6 = vpop.eup %585  ;;  %599 = vlog2.f32 %v371_v39 }
 0x226   :  { %437 = vst [vmem:[%s836_s3 + $0x58] sm:$0xff] %v421_v10  ;;  %v588_v41 = vpop.eup %587  ;;  %v381_v42 = vmul.f32 0.6931472, %v586_v6 }
 0x227   :  { %426 = vst [vmem:[%s836_s3] sm:$0xff] %v410_v40  ;;  %v395_v43 = vmul.f32 0.6931472, %v588_v41  ;;  %v373_v46 = vpop.xlane.xlu1 %372 }
 0x228   :  { %v375_v16 = vpop.xlane.xlu0 %374  ;;  %v411_v47 = vsub.f32 %v739_v24, %v381_v42  ;;  %601 = vlog2.f32 %v373_v46 }
 0x229   :  { %v590_v12 = vpop.eup %589  ;;  %v418_v48 = vsub.f32 %v732_v17, %v395_v43  ;;  %603 = vlog2.f32 %v375_v16 }
 0x22a   :  { %v592_v49 = vpop.eup %591  ;;  %427 = vst [vmem:[%s836_s3 + $0x8] sm:$0xff] %v411_v47  ;;  %v397_v50 = vmul.f32 0.6931472, %v590_v12 }
 0x22b   :  { %434 = vst [vmem:[%s836_s3 + $0x40] sm:$0xff] %v418_v48  ;;  %v391_v51 = vmul.f32 0.6931472, %v592_v49  ;;  %v377_v53 = vpop.xlane.xlu1 %376 }
 0x22c   :  { %v419_v55 = vsub.f32 %v737_v23, %v397_v50  ;;  %605 = vlog2.f32 %v377_v53 }
 0x22d   :  { %v594_v24 = vpop.eup %593  ;;  %v416_v56 = vsub.f32 %v745_v30, %v391_v51 }
 0x22e   :  { %v596_v17 = vpop.eup %595  ;;  %435 = vst [vmem:[%s836_s3 + $0x48] sm:$0xff] %v419_v55  ;;  %v393_v57 = vmul.f32 0.6931472, %v594_v24 }
 0x22f   :  { %432 = vst [vmem:[%s836_s3 + $0x30] sm:$0xff] %v416_v56  ;;  %v387_v58 = vmul.f32 0.6931472, %v596_v17 }
 0x230   :  { %v417_v59 = vsub.f32 %v743_v29, %v393_v57 }
 0x231   :  { %v598_v60 = vpop.eup %597  ;;  %v414_v23 = vsub.f32 %v751_v37, %v387_v58 }
 0x232   :  { %v600_v61 = vpop.eup %599  ;;  %433 = vst [vmem:[%s836_s3 + $0x38] sm:$0xff] %v417_v59  ;;  %v389_v30 = vmul.f32 0.6931472, %v598_v60 }
 0x233   :  { %430 = vst [vmem:[%s836_s3 + $0x20] sm:$0xff] %v414_v23  ;;  %v403_v62 = vmul.f32 0.6931472, %v600_v61 }
 0x234   :  { %v415_v63 = vsub.f32 %v749_v36, %v389_v30 }
 0x235   :  { %v602_v0 = vpop.eup %601  ;;  %v422_v1 = vsub.f32 %v757_v45, %v403_v62 }
 0x236   :  { %v604_v29 = vpop.eup %603  ;;  %431 = vst [vmem:[%s836_s3 + $0x28] sm:$0xff] %v415_v63  ;;  %v405_v37 = vmul.f32 0.6931472, %v602_v0 }
 0x237   :  { %438 = vst [vmem:[%s836_s3 + $0x60] sm:$0xff] %v422_v1  ;;  %v407_v2 = vmul.f32 0.6931472, %v604_v29 }
 0x238   :  { %v423_v3 = vsub.f32 %v755_v44, %v405_v37 }
 0x239   :  { %v606_v4 = vpop.eup %605  ;;  %v424_v7 = vsub.f32 %v762_v52, %v407_v2 }
 0x23a   :  { %439 = vst [vmem:[%s836_s3 + $0x68] sm:$0xff] %v423_v3  ;;  %v409_v36 = vmul.f32 0.6931472, %v606_v4 }
 0x23b   :  { %440 = vst [vmem:[%s836_s3 + $0x70] sm:$0xff] %v424_v7 }
 0x23c   :  { %v425_v45 = vsub.f32 %v765_v54, %v409_v36 }
 0x23e   :  { %441 = vst [vmem:[%s836_s3 + $0x78] sm:$0xff] %v425_v45 }

</bundles_post_ra>
